<compile_context>
chip_gen: v5e
topology: v5e:2x2
jax: 0.10.0
libtpu: 0.0.40
codegen_flags: <defaults>
</compile_context>

<pallas_src>
import numpy as np
import jax
import jax.numpy as jnp
from jax.experimental import pallas as pl
from jax.experimental.pallas import tpu as pltpu

# ---------------- model hyper-parameters (small, consistent with module) ----
D_MODEL = 32
NHEAD = 4
DIM_FF = 64
HEAD_DIM = D_MODEL // NHEAD
EPS = 1e-5

SEQ_TGT = 8     # Lq
SEQ_MEM = 8     # Lk
BATCH = 2       # N

# rows of the packed bias / LayerNorm table (width = DIM_FF = 64, zero-padded)
_B_SA_Q, _B_SA_K, _B_SA_V, _B_SA_O = 0, 1, 2, 3
_B_CA_Q, _B_CA_K, _B_CA_V, _B_CA_O = 4, 5, 6, 7
_B_L1, _B_L2 = 8, 9
_B_N1G, _B_N1B, _B_N2G, _B_N2B, _B_N3G, _B_N3B = 10, 11, 12, 13, 14, 15
_BIAS_ROWS = 16


# ---------------- constant mask table (built at trace time with numpy) -------
def _build_masks(n, lq, lk):
    """One packed (R_pad + C, W) table holding:
       rows [0:R)        cols [0:C): additive cross-batch mask (0 / -1e9)
       rows [R_pad:R_pad+C) cols [0:E): block-diagonal head mask (0 / 1),
                                        also used as the denominator matrix."""
    E = D_MODEL
    R, RK = n * lq, n * lk
    C = NHEAD * RK
    R_pad = -(-R // 8) * 8
    W = max(C, E)
    mpack = np.zeros((R_pad + C, W), np.float32)

    # fused row i = l*n + b  -> batch = i % n ; score column c = h*RK + j -> batch = c % n
    qb = np.arange(R) % n
    cb = np.arange(C) % n
    mpack[:R, :C] = np.where(qb[:, None] == cb[None, :], 0.0, -1e9).astype(np.float32)

    ch = np.arange(C) // RK          # head of score column
    dh = np.arange(E) // HEAD_DIM    # head of model dim
    mpack[R_pad:R_pad + C, :E] = (ch[:, None] == dh[None, :]).astype(np.float32)
    return jnp.asarray(mpack), R_pad


# ---------------- the fused decoder-layer kernel -----------------------------
def _make_kernel(n, lq, lk, r_pad):
    E, F, H = D_MODEL, DIM_FF, NHEAD
    R = n * lq            # fused query rows
    RK = n * lk           # fused key rows
    C = H * RK            # score columns (head-major, then fused key row)

    def kernel(qs_ref, ks_ref, in_w, out_w, l1_w, l2_w, bias_ref, mask_ref, out_ref):
        tgt = qs_ref[0]               # (R, E)
        qpos = qs_ref[1]              # (R, E)
        mem = ks_ref[0]               # (RK, E)
        k_in = mem + ks_ref[1]        # memory + pos (shared by both attentions)

        B = bias_ref[...]                          # (16, 64) bias / LN table
        batch_neg = mask_ref[0:R, 0:C]             # (R, C) additive cross-batch mask
        head_mask = mask_ref[r_pad:r_pad + C, 0:E]  # (C, E) block-diag head mask

        def brow(r, width=E):
            return B[r:r + 1, 0:width]             # (1, width)

        def layer_norm(x, g, b):
            mu = jnp.mean(x, axis=-1, keepdims=True)
            xc = x - mu
            var = jnp.mean(xc * xc, axis=-1, keepdims=True)
            return xc * jax.lax.rsqrt(var + EPS) * g + b

        def attention(q_in, wq, wk, wv, bq, bk, bv, wo, bo):
            # full-width projections (q-scale pre-folded into wq / bq)
            q = jnp.dot(q_in, wq, preferred_element_type=jnp.float32) + bq   # (R, E)
            k = jnp.dot(k_in, wk, preferred_element_type=jnp.float32) + bk   # (RK, E)
            v = jnp.dot(mem, wv, preferred_element_type=jnp.float32) + bv    # (RK, E)

            # all-head K/V slabs: sublane-tile + block-diagonal mask (VPU filler)
            k_bd = jnp.concatenate([k] * H, axis=0) * head_mask              # (C, E)
            v_bd = jnp.concatenate([v] * H, axis=0) * head_mask              # (C, E)

            # scores for every (head, batch, key) column in one MXU push
            s = jax.lax.dot_general(q, k_bd, (((1,), (1,)), ((), ())),
                                    preferred_element_type=jnp.float32)      # (R, C)
            s = s + batch_neg
            p = jnp.exp(s - jnp.max(s, axis=-1, keepdims=True))

            # unnormalized PV and matching per-(row, head) denominators, both (R, E)
            o_un = jnp.dot(p, v_bd, preferred_element_type=jnp.float32)
            den = jnp.dot(p, head_mask, preferred_element_type=jnp.float32)
            o = o_un * pl.reciprocal(den, approx=True)
            return jnp.dot(o, wo, preferred_element_type=jnp.float32) + bo   # out-proj

        # ---- block 1 (module's self_attn: q = tgt+query_pos, k = memory+pos, v = memory)
        x = tgt
        t2 = attention(x + qpos, in_w[0], in_w[1], in_w[2],
                       brow(_B_SA_Q), brow(_B_SA_K), brow(_B_SA_V),
                       out_w[0], brow(_B_SA_O))
        x = layer_norm(x + t2, brow(_B_N1G), brow(_B_N1B))

        # ---- block 2 (multihead_attn)
        t2 = attention(x + qpos, in_w[3], in_w[4], in_w[5],
                       brow(_B_CA_Q), brow(_B_CA_K), brow(_B_CA_V),
                       out_w[1], brow(_B_CA_O))
        x = layer_norm(x + t2, brow(_B_N2G), brow(_B_N2B))

        # ---- feed-forward (linear1 -> relu -> linear2)
        h = jnp.maximum(
            jnp.dot(x, l1_w[...], preferred_element_type=jnp.float32) + brow(_B_L1, F),
            0.0)
        t2 = jnp.dot(h, l2_w[...], preferred_element_type=jnp.float32) + brow(_B_L2)
        x = layer_norm(x + t2, brow(_B_N3G), brow(_B_N3B))

        out_ref[...] = x.astype(out_ref.dtype)

    return kernel


# ---------------- one-time parameter prep ------------------------------------
def pack_params(params):
    """Transpose weights to (in, out), reshape in-proj to (3, E, E), fold the
    1/sqrt(Dh) q-scale into Wq/bq, pack biases/LN vectors into one (16, 64) table."""
    E, F = D_MODEL, DIM_FF
    scale = 1.0 / (HEAD_DIM ** 0.5)

    def qkv_t(w):    # (3E, E) PyTorch layout -> (3, E, E) = [Wq.T*scale, Wk.T, Wv.T]
        return jnp.stack([w[:E].T * scale, w[E:2 * E].T, w[2 * E:].T], axis=0)

    def row(v, width=F):
        v = jnp.asarray(v, jnp.float32).reshape(-1)
        return jnp.pad(v, (0, width - v.shape[0]))

    sab = params["sa_in_b"].reshape(-1)
    cab = params["ca_in_b"].reshape(-1)
    rows = [
        row(sab[:E] * scale), row(sab[E:2 * E]), row(sab[2 * E:]), row(params["sa_out_b"]),
        row(cab[:E] * scale), row(cab[E:2 * E]), row(cab[2 * E:]), row(params["ca_out_b"]),
        row(params["l1_b"]), row(params["l2_b"]),
        row(params["n1_g"]), row(params["n1_b"]),
        row(params["n2_g"]), row(params["n2_b"]),
        row(params["n3_g"]), row(params["n3_b"]),
    ]
    assert len(rows) == _BIAS_ROWS
    return {
        "in_w6": jnp.concatenate([qkv_t(params["sa_in_w"]), qkv_t(params["ca_in_w"])], axis=0),
        "out_w2": jnp.stack([params["sa_out_w"].T, params["ca_out_w"].T], axis=0),
        "l1_wT": params["l1_w"].T,
        "l2_wT": params["l2_w"].T,
        "bias_pack": jnp.stack(rows, axis=0),     # (16, 64)
    }


# ---------------- wrapper -----------------------------------------------------
@jax.jit
def transformer_decoder_layer(tgt, memory, packed, pos=None, query_pos=None):
    """tgt: (Lq, N, E), memory: (Lk, N, E) — returns (Lq, N, E). Eval mode."""
    lq, n, e = tgt.shape
    lk = memory.shape[0]
    assert e == D_MODEL and memory.shape[1] == n
    if query_pos is None:
        query_pos = jnp.zeros_like(tgt)
    if pos is None:
        pos = jnp.zeros_like(memory)

    R, RK = n * lq, n * lk
    # (L, N, E) -> (L*N, E) is a pure reshape (row i = l*N + b): no transposes.
    qstack = jnp.stack([tgt.reshape(R, e), query_pos.reshape(R, e)], axis=0)     # (2, R, E)
    kstack = jnp.stack([memory.reshape(RK, e), pos.reshape(RK, e)], axis=0)      # (2, RK, E)

    mask_pack, r_pad = _build_masks(n, lq, lk)
    kernel = _make_kernel(n, lq, lk, r_pad)

    operands = (qstack, kstack, packed["in_w6"], packed["out_w2"],
                packed["l1_wT"], packed["l2_wT"], packed["bias_pack"], mask_pack)

    def full_spec(shape):
        zeros = (0,) * len(shape)
        return pl.BlockSpec(tuple(shape), lambda i, _z=zeros: _z)

    out = pl.pallas_call(
        kernel,
        out_shape=jax.ShapeDtypeStruct((R, e), jnp.float32),
        grid=(1,),
        in_specs=[full_spec(x.shape) for x in operands],
        out_specs=pl.BlockSpec((R, e), lambda i: (0, 0)),
        compiler_params=pltpu.CompilerParams(dimension_semantics=("arbitrary",)),
    )(*operands)

    return out.reshape(lq, n, e)


# ---------------- deterministic parameter init (PyTorch layout) ----------------
def init_params(key):
    ks = jax.random.split(key, 12)

    def w(k, shape, scale=0.05):
        return jax.random.normal(k, shape, jnp.float32) * scale

    E, F = D_MODEL, DIM_FF
    return {
        "sa_in_w": w(ks[0], (3 * E, E)),
        "sa_in_b": w(ks[1], (1, 3 * E), 0.01),
        "sa_out_w": w(ks[2], (E, E)),
        "sa_out_b": w(ks[3], (1, E), 0.01),
        "ca_in_w": w(ks[4], (3 * E, E)),
        "ca_in_b": w(ks[5], (1, 3 * E), 0.01),
        "ca_out_w": w(ks[6], (E, E)),
        "ca_out_b": w(ks[7], (1, E), 0.01),
        "l1_w": w(ks[8], (F, E)),
        "l1_b": w(ks[9], (1, F), 0.01),
        "l2_w": w(ks[10], (E, F)),
        "l2_b": w(ks[11], (1, E), 0.01),
        "n1_g": jnp.ones((1, E), jnp.float32),
        "n1_b": jnp.zeros((1, E), jnp.float32),
        "n2_g": jnp.ones((1, E), jnp.float32),
        "n2_b": jnp.zeros((1, E), jnp.float32),
        "n3_g": jnp.ones((1, E), jnp.float32),
        "n3_b": jnp.zeros((1, E), jnp.float32),
    }


# ---------------- pure-JAX reference (mirrors the PyTorch module, eval mode) ----
def _ref_mha(q_in, k_in, v_in, in_w, in_b, out_w, out_b):
    E = D_MODEL
    q = q_in @ in_w[:E].T + in_b[0, :E]
    k = k_in @ in_w[E:2 * E].T + in_b[0, E:2 * E]
    v = v_in @ in_w[2 * E:].T + in_b[0, 2 * E:]
    N, Lq, _ = q.shape
    Lk = k.shape[1]
    q = q.reshape(N, Lq, NHEAD, HEAD_DIM).transpose(0, 2, 1, 3) / (HEAD_DIM ** 0.5)
    k = k.reshape(N, Lk, NHEAD, HEAD_DIM).transpose(0, 2, 1, 3)
    v = v.reshape(N, Lk, NHEAD, HEAD_DIM).transpose(0, 2, 1, 3)
    s = jnp.einsum("nhqd,nhkd->nhqk", q, k)
    p = jax.nn.softmax(s, axis=-1)
    o = jnp.einsum("nhqk,nhkd->nhqd", p, v)
    o = o.transpose(0, 2, 1, 3).reshape(N, Lq, E)
    return o @ out_w.T + out_b[0]


def _ref_ln(x, g, b):
    mu = jnp.mean(x, axis=-1, keepdims=True)
    var = jnp.mean((x - mu) ** 2, axis=-1, keepdims=True)
    return (x - mu) / jnp.sqrt(var + EPS) * g[0] + b[0]


def reference_decoder_layer(tgt, memory, params, pos, query_pos):
    t = jnp.transpose(tgt, (1, 0, 2))
    m = jnp.transpose(memory, (1, 0, 2))
    qp = jnp.transpose(query_pos, (1, 0, 2))
    pp = jnp.transpose(pos, (1, 0, 2))
    p = params

    t2 = _ref_mha(t + qp, m + pp, m, p["sa_in_w"], p["sa_in_b"], p["sa_out_w"], p["sa_out_b"])
    t = _ref_ln(t + t2, p["n1_g"], p["n1_b"])
    t2 = _ref_mha(t + qp, m + pp, m, p["ca_in_w"], p["ca_in_b"], p["ca_out_w"], p["ca_out_b"])
    t = _ref_ln(t + t2, p["n2_g"], p["n2_b"])
    h = jnp.maximum(t @ p["l1_w"].T + p["l1_b"][0], 0.0)
    t2 = h @ p["l2_w"].T + p["l2_b"][0]
    t = _ref_ln(t + t2, p["n3_g"], p["n3_b"])
    return jnp.transpose(t, (1, 0, 2))


# ---------------- main ---------------------------------------------------------
if __name__ == "__main__":
    key = jax.random.PRNGKey(0)
    k_tgt, k_mem, k_qp, k_pos, k_param = jax.random.split(key, 5)

    tgt = jax.random.normal(k_tgt, (SEQ_TGT, BATCH, D_MODEL), jnp.float32)
    memory = jax.random.normal(k_mem, (SEQ_MEM, BATCH, D_MODEL), jnp.float32)
    query_pos = jax.random.normal(k_qp, (SEQ_TGT, BATCH, D_MODEL), jnp.float32)
    pos = jax.random.normal(k_pos, (SEQ_MEM, BATCH, D_MODEL), jnp.float32)

    params = init_params(k_param)
    packed = pack_params(params)      # one-time weight transpose / fold / pack

    out = transformer_decoder_layer(tgt, memory, packed, pos=pos, query_pos=query_pos)
    out = jax.block_until_ready(out)

    ref = reference_decoder_layer(tgt, memory, params, pos, query_pos)
    ref = jax.block_until_ready(ref)

    assert out.shape == (SEQ_TGT, BATCH, D_MODEL), out.shape
    max_err = float(jnp.max(jnp.abs(out - ref)))
    # approx EUP reciprocal in the softmax denominator -> tolerance 1e-3
    assert max_err < 1e-3, f"mismatch vs reference: {max_err}"

    print("KERNEL_OK")
</pallas_src>

<mosaic_0001>
module attributes {stable_mosaic.version = 11 : i64} {
  func.func @kernel(%arg0: i32, %arg1: memref<2x16x32xf32, #tpu.memory_space<vmem>>, %arg2: memref<2x16x32xf32, #tpu.memory_space<vmem>>, %arg3: memref<6x32x32xf32, #tpu.memory_space<vmem>>, %arg4: memref<2x32x32xf32, #tpu.memory_space<vmem>>, %arg5: memref<32x64xf32, #tpu.memory_space<vmem>>, %arg6: memref<64x32xf32, #tpu.memory_space<vmem>>, %arg7: memref<16x64xf32, #tpu.memory_space<vmem>>, %arg8: memref<80x64xf32, #tpu.memory_space<vmem>>, %arg9: memref<16x32xf32, #tpu.memory_space<vmem>>) attributes {dimension_semantics = [#tpu.dimension_semantics<arbitrary>], iteration_bounds = array<i64: 1>, scalar_prefetch = 0 : i64, scratch_operands = 0 : i64, tpu.core_type = #tpu.core_type<tc>, window_params = [{pipeline_mode = #tpu.pipeline_mode<synchronous>, transform_indices = @transform_0, window_bounds = array<i64: 2, 16, 32>}, {pipeline_mode = #tpu.pipeline_mode<synchronous>, transform_indices = @transform_1, window_bounds = array<i64: 2, 16, 32>}, {pipeline_mode = #tpu.pipeline_mode<synchronous>, transform_indices = @transform_2, window_bounds = array<i64: 6, 32, 32>}, {pipeline_mode = #tpu.pipeline_mode<synchronous>, transform_indices = @transform_3, window_bounds = array<i64: 2, 32, 32>}, {pipeline_mode = #tpu.pipeline_mode<synchronous>, transform_indices = @transform_4, window_bounds = array<i64: 32, 64>}, {pipeline_mode = #tpu.pipeline_mode<synchronous>, transform_indices = @transform_5, window_bounds = array<i64: 64, 32>}, {pipeline_mode = #tpu.pipeline_mode<synchronous>, transform_indices = @transform_6, window_bounds = array<i64: 16, 64>}, {pipeline_mode = #tpu.pipeline_mode<synchronous>, transform_indices = @transform_7, window_bounds = array<i64: 80, 64>}, {pipeline_mode = #tpu.pipeline_mode<synchronous>, transform_indices = @transform_8, window_bounds = array<i64: 16, 32>}]} {
    %c0 = arith.constant 0 : index
    %c0_0 = arith.constant 0 : index
    %c0_1 = arith.constant 0 : index
    %0 = vector.load %arg1[%c0, %c0_0, %c0_1] : memref<2x16x32xf32, #tpu.memory_space<vmem>>, vector<1x16x32xf32>
    %1 = vector.shape_cast %0 : vector<1x16x32xf32> to vector<16x32xf32>
    %c1 = arith.constant 1 : index
    %c0_2 = arith.constant 0 : index
    %c0_3 = arith.constant 0 : index
    %2 = vector.load %arg1[%c1, %c0_2, %c0_3] : memref<2x16x32xf32, #tpu.memory_space<vmem>>, vector<1x16x32xf32>
    %3 = vector.shape_cast %2 : vector<1x16x32xf32> to vector<16x32xf32>
    %c0_4 = arith.constant 0 : index
    %c0_5 = arith.constant 0 : index
    %c0_6 = arith.constant 0 : index
    %4 = vector.load %arg2[%c0_4, %c0_5, %c0_6] : memref<2x16x32xf32, #tpu.memory_space<vmem>>, vector<1x16x32xf32>
    %5 = vector.shape_cast %4 : vector<1x16x32xf32> to vector<16x32xf32>
    %c1_7 = arith.constant 1 : index
    %c0_8 = arith.constant 0 : index
    %c0_9 = arith.constant 0 : index
    %6 = vector.load %arg2[%c1_7, %c0_8, %c0_9] : memref<2x16x32xf32, #tpu.memory_space<vmem>>, vector<1x16x32xf32>
    %7 = vector.shape_cast %6 : vector<1x16x32xf32> to vector<16x32xf32>
    %8 = arith.addf %5, %7 : vector<16x32xf32>
    %c0_10 = arith.constant 0 : index
    %c0_11 = arith.constant 0 : index
    %9 = vector.load %arg7[%c0_10, %c0_11] : memref<16x64xf32, #tpu.memory_space<vmem>>, vector<16x64xf32>
    %c0_12 = arith.constant 0 : index
    %c0_13 = arith.constant 0 : index
    %10 = vector.load %arg8[%c0_12, %c0_13] : memref<80x64xf32, #tpu.memory_space<vmem>>, vector<16x64xf32>
    %c16 = arith.constant 16 : index
    %c0_14 = arith.constant 0 : index
    %11 = vector.load %arg8[%c16, %c0_14] : memref<80x64xf32, #tpu.memory_space<vmem>>, vector<64x32xf32>
    %12 = arith.addf %1, %3 : vector<16x32xf32>
    %c0_15 = arith.constant 0 : index
    %c0_16 = arith.constant 0 : index
    %c0_17 = arith.constant 0 : index
    %13 = vector.load %arg3[%c0_15, %c0_16, %c0_17] : memref<6x32x32xf32, #tpu.memory_space<vmem>>, vector<1x32x32xf32>
    %14 = vector.shape_cast %13 : vector<1x32x32xf32> to vector<32x32xf32>
    %c1_18 = arith.constant 1 : index
    %c0_19 = arith.constant 0 : index
    %c0_20 = arith.constant 0 : index
    %15 = vector.load %arg3[%c1_18, %c0_19, %c0_20] : memref<6x32x32xf32, #tpu.memory_space<vmem>>, vector<1x32x32xf32>
    %16 = vector.shape_cast %15 : vector<1x32x32xf32> to vector<32x32xf32>
    %c2 = arith.constant 2 : index
    %c0_21 = arith.constant 0 : index
    %c0_22 = arith.constant 0 : index
    %17 = vector.load %arg3[%c2, %c0_21, %c0_22] : memref<6x32x32xf32, #tpu.memory_space<vmem>>, vector<1x32x32xf32>
    %18 = vector.shape_cast %17 : vector<1x32x32xf32> to vector<32x32xf32>
    %19 = vector.extract_strided_slice %9 {offsets = [0, 0], sizes = [1, 32], strides = [1, 1]} : vector<16x64xf32> to vector<1x32xf32>
    %20 = vector.extract_strided_slice %9 {offsets = [1, 0], sizes = [1, 32], strides = [1, 1]} : vector<16x64xf32> to vector<1x32xf32>
    %21 = vector.extract_strided_slice %9 {offsets = [2, 0], sizes = [1, 32], strides = [1, 1]} : vector<16x64xf32> to vector<1x32xf32>
    %c0_23 = arith.constant 0 : index
    %c0_24 = arith.constant 0 : index
    %c0_25 = arith.constant 0 : index
    %22 = vector.load %arg4[%c0_23, %c0_24, %c0_25] : memref<2x32x32xf32, #tpu.memory_space<vmem>>, vector<1x32x32xf32>
    %23 = vector.shape_cast %22 : vector<1x32x32xf32> to vector<32x32xf32>
    %24 = vector.extract_strided_slice %9 {offsets = [3, 0], sizes = [1, 32], strides = [1, 1]} : vector<16x64xf32> to vector<1x32xf32>
    %cst = arith.constant dense<0.000000e+00> : vector<16x32xf32>
    %25 = tpu.matmul %12, %14, %cst {dimension_numbers = #tpu.dot_dimension_numbers<[1], [0], [0], [1], [0, 0, 1, 1], [], []>} : vector<16x32xf32>, vector<32x32xf32>, vector<16x32xf32> -> vector<16x32xf32>
    %26 = vector.broadcast %19 : vector<1x32xf32> to vector<16x32xf32>
    %27 = arith.addf %25, %26 : vector<16x32xf32>
    %cst_26 = arith.constant dense<0.000000e+00> : vector<16x32xf32>
    %28 = tpu.matmul %8, %16, %cst_26 {dimension_numbers = #tpu.dot_dimension_numbers<[1], [0], [0], [1], [0, 0, 1, 1], [], []>} : vector<16x32xf32>, vector<32x32xf32>, vector<16x32xf32> -> vector<16x32xf32>
    %29 = vector.broadcast %20 : vector<1x32xf32> to vector<16x32xf32>
    %30 = arith.addf %28, %29 : vector<16x32xf32>
    %cst_27 = arith.constant dense<0.000000e+00> : vector<16x32xf32>
    %31 = tpu.matmul %5, %18, %cst_27 {dimension_numbers = #tpu.dot_dimension_numbers<[1], [0], [0], [1], [0, 0, 1, 1], [], []>} : vector<16x32xf32>, vector<32x32xf32>, vector<16x32xf32> -> vector<16x32xf32>
    %32 = vector.broadcast %21 : vector<1x32xf32> to vector<16x32xf32>
    %33 = arith.addf %31, %32 : vector<16x32xf32>
    %34 = tpu.concatenate %30, %30, %30, %30 in 0 : vector<16x32xf32>, vector<16x32xf32>, vector<16x32xf32>, vector<16x32xf32> -> vector<64x32xf32>
    %35 = arith.mulf %34, %11 : vector<64x32xf32>
    %36 = tpu.concatenate %33, %33, %33, %33 in 0 : vector<16x32xf32>, vector<16x32xf32>, vector<16x32xf32>, vector<16x32xf32> -> vector<64x32xf32>
    %37 = arith.mulf %36, %11 : vector<64x32xf32>
    %cst_28 = arith.constant dense<0.000000e+00> : vector<16x64xf32>
    %38 = tpu.matmul %27, %35, %cst_28 {dimension_numbers = #tpu.dot_dimension_numbers<[1], [1], [0], [0], [0, 0, 1, 0], [], []>} : vector<16x32xf32>, vector<64x32xf32>, vector<16x64xf32> -> vector<16x64xf32>
    %39 = arith.addf %38, %10 : vector<16x64xf32>
    %cst_29 = arith.constant dense<0xFF800000> : vector<16xf32>
    %40 = vector.multi_reduction <maximumf>, %39, %cst_29 [1] : vector<16x64xf32> to vector<16xf32>
    %41 = vector.shape_cast %40 : vector<16xf32> to vector<16x1xf32>
    %42 = vector.broadcast %41 : vector<16x1xf32> to vector<16x64xf32>
    %43 = arith.subf %39, %42 : vector<16x64xf32>
    %44 = math.exp %43 : vector<16x64xf32>
    %cst_30 = arith.constant dense<0.000000e+00> : vector<16x32xf32>
    %45 = tpu.matmul %44, %37, %cst_30 {dimension_numbers = #tpu.dot_dimension_numbers<[1], [0], [0], [1], [0, 0, 1, 1], [], []>} : vector<16x64xf32>, vector<64x32xf32>, vector<16x32xf32> -> vector<16x32xf32>
    %cst_31 = arith.constant dense<0.000000e+00> : vector<16x32xf32>
    %46 = tpu.matmul %44, %11, %cst_31 {dimension_numbers = #tpu.dot_dimension_numbers<[1], [0], [0], [1], [0, 0, 1, 1], [], []>} : vector<16x64xf32>, vector<64x32xf32>, vector<16x32xf32> -> vector<16x32xf32>
    %47 = tpu.reciprocal %46 {approx = true} : vector<16x32xf32> -> vector<16x32xf32>
    %48 = arith.mulf %45, %47 : vector<16x32xf32>
    %cst_32 = arith.constant dense<0.000000e+00> : vector<16x32xf32>
    %49 = tpu.matmul %48, %23, %cst_32 {dimension_numbers = #tpu.dot_dimension_numbers<[1], [0], [0], [1], [0, 0, 1, 1], [], []>} : vector<16x32xf32>, vector<32x32xf32>, vector<16x32xf32> -> vector<16x32xf32>
    %50 = vector.broadcast %24 : vector<1x32xf32> to vector<16x32xf32>
    %51 = arith.addf %49, %50 : vector<16x32xf32>
    %52 = arith.addf %1, %51 : vector<16x32xf32>
    %53 = vector.extract_strided_slice %9 {offsets = [10, 0], sizes = [1, 32], strides = [1, 1]} : vector<16x64xf32> to vector<1x32xf32>
    %54 = vector.extract_strided_slice %9 {offsets = [11, 0], sizes = [1, 32], strides = [1, 1]} : vector<16x64xf32> to vector<1x32xf32>
    %cst_33 = arith.constant dense<0.000000e+00> : vector<16xf32>
    %55 = vector.multi_reduction <add>, %52, %cst_33 [1] : vector<16x32xf32> to vector<16xf32>
    %56 = vector.shape_cast %55 : vector<16xf32> to vector<16x1xf32>
    %cst_34 = arith.constant 3.200000e+01 : f32
    %57 = vector.broadcast %cst_34 : f32 to vector<16x1xf32>
    %58 = arith.divf %56, %57 : vector<16x1xf32>
    %59 = vector.broadcast %58 : vector<16x1xf32> to vector<16x32xf32>
    %60 = arith.subf %52, %59 : vector<16x32xf32>
    %61 = arith.mulf %60, %60 : vector<16x32xf32>
    %cst_35 = arith.constant dense<0.000000e+00> : vector<16xf32>
    %62 = vector.multi_reduction <add>, %61, %cst_35 [1] : vector<16x32xf32> to vector<16xf32>
    %63 = vector.shape_cast %62 : vector<16xf32> to vector<16x1xf32>
    %cst_36 = arith.constant 3.200000e+01 : f32
    %64 = vector.broadcast %cst_36 : f32 to vector<16x1xf32>
    %65 = arith.divf %63, %64 : vector<16x1xf32>
    %cst_37 = arith.constant 9.99999974E-6 : f32
    %66 = vector.broadcast %cst_37 : f32 to vector<16x1xf32>
    %67 = arith.addf %65, %66 : vector<16x1xf32>
    %68 = math.rsqrt %67 : vector<16x1xf32>
    %69 = vector.broadcast %68 : vector<16x1xf32> to vector<16x32xf32>
    %70 = arith.mulf %60, %69 : vector<16x32xf32>
    %71 = vector.broadcast %53 : vector<1x32xf32> to vector<16x32xf32>
    %72 = arith.mulf %70, %71 : vector<16x32xf32>
    %73 = vector.broadcast %54 : vector<1x32xf32> to vector<16x32xf32>
    %74 = arith.addf %72, %73 : vector<16x32xf32>
    %75 = arith.addf %74, %3 : vector<16x32xf32>
    %c3 = arith.constant 3 : index
    %c0_38 = arith.constant 0 : index
    %c0_39 = arith.constant 0 : index
    %76 = vector.load %arg3[%c3, %c0_38, %c0_39] : memref<6x32x32xf32, #tpu.memory_space<vmem>>, vector<1x32x32xf32>
    %77 = vector.shape_cast %76 : vector<1x32x32xf32> to vector<32x32xf32>
    %c4 = arith.constant 4 : index
    %c0_40 = arith.constant 0 : index
    %c0_41 = arith.constant 0 : index
    %78 = vector.load %arg3[%c4, %c0_40, %c0_41] : memref<6x32x32xf32, #tpu.memory_space<vmem>>, vector<1x32x32xf32>
    %79 = vector.shape_cast %78 : vector<1x32x32xf32> to vector<32x32xf32>
    %c5 = arith.constant 5 : index
    %c0_42 = arith.constant 0 : index
    %c0_43 = arith.constant 0 : index
    %80 = vector.load %arg3[%c5, %c0_42, %c0_43] : memref<6x32x32xf32, #tpu.memory_space<vmem>>, vector<1x32x32xf32>
    %81 = vector.shape_cast %80 : vector<1x32x32xf32> to vector<32x32xf32>
    %82 = vector.extract_strided_slice %9 {offsets = [4, 0], sizes = [1, 32], strides = [1, 1]} : vector<16x64xf32> to vector<1x32xf32>
    %83 = vector.extract_strided_slice %9 {offsets = [5, 0], sizes = [1, 32], strides = [1, 1]} : vector<16x64xf32> to vector<1x32xf32>
    %84 = vector.extract_strided_slice %9 {offsets = [6, 0], sizes = [1, 32], strides = [1, 1]} : vector<16x64xf32> to vector<1x32xf32>
    %c1_44 = arith.constant 1 : index
    %c0_45 = arith.constant 0 : index
    %c0_46 = arith.constant 0 : index
    %85 = vector.load %arg4[%c1_44, %c0_45, %c0_46] : memref<2x32x32xf32, #tpu.memory_space<vmem>>, vector<1x32x32xf32>
    %86 = vector.shape_cast %85 : vector<1x32x32xf32> to vector<32x32xf32>
    %87 = vector.extract_strided_slice %9 {offsets = [7, 0], sizes = [1, 32], strides = [1, 1]} : vector<16x64xf32> to vector<1x32xf32>
    %cst_47 = arith.constant dense<0.000000e+00> : vector<16x32xf32>
    %88 = tpu.matmul %75, %77, %cst_47 {dimension_numbers = #tpu.dot_dimension_numbers<[1], [0], [0], [1], [0, 0, 1, 1], [], []>} : vector<16x32xf32>, vector<32x32xf32>, vector<16x32xf32> -> vector<16x32xf32>
    %89 = vector.broadcast %82 : vector<1x32xf32> to vector<16x32xf32>
    %90 = arith.addf %88, %89 : vector<16x32xf32>
    %cst_48 = arith.constant dense<0.000000e+00> : vector<16x32xf32>
    %91 = tpu.matmul %8, %79, %cst_48 {dimension_numbers = #tpu.dot_dimension_numbers<[1], [0], [0], [1], [0, 0, 1, 1], [], []>} : vector<16x32xf32>, vector<32x32xf32>, vector<16x32xf32> -> vector<16x32xf32>
    %92 = vector.broadcast %83 : vector<1x32xf32> to vector<16x32xf32>
    %93 = arith.addf %91, %92 : vector<16x32xf32>
    %cst_49 = arith.constant dense<0.000000e+00> : vector<16x32xf32>
    %94 = tpu.matmul %5, %81, %cst_49 {dimension_numbers = #tpu.dot_dimension_numbers<[1], [0], [0], [1], [0, 0, 1, 1], [], []>} : vector<16x32xf32>, vector<32x32xf32>, vector<16x32xf32> -> vector<16x32xf32>
    %95 = vector.broadcast %84 : vector<1x32xf32> to vector<16x32xf32>
    %96 = arith.addf %94, %95 : vector<16x32xf32>
    %97 = tpu.concatenate %93, %93, %93, %93 in 0 : vector<16x32xf32>, vector<16x32xf32>, vector<16x32xf32>, vector<16x32xf32> -> vector<64x32xf32>
    %98 = arith.mulf %97, %11 : vector<64x32xf32>
    %99 = tpu.concatenate %96, %96, %96, %96 in 0 : vector<16x32xf32>, vector<16x32xf32>, vector<16x32xf32>, vector<16x32xf32> -> vector<64x32xf32>
    %100 = arith.mulf %99, %11 : vector<64x32xf32>
    %cst_50 = arith.constant dense<0.000000e+00> : vector<16x64xf32>
    %101 = tpu.matmul %90, %98, %cst_50 {dimension_numbers = #tpu.dot_dimension_numbers<[1], [1], [0], [0], [0, 0, 1, 0], [], []>} : vector<16x32xf32>, vector<64x32xf32>, vector<16x64xf32> -> vector<16x64xf32>
    %102 = arith.addf %101, %10 : vector<16x64xf32>
    %cst_51 = arith.constant dense<0xFF800000> : vector<16xf32>
    %103 = vector.multi_reduction <maximumf>, %102, %cst_51 [1] : vector<16x64xf32> to vector<16xf32>
    %104 = vector.shape_cast %103 : vector<16xf32> to vector<16x1xf32>
    %105 = vector.broadcast %104 : vector<16x1xf32> to vector<16x64xf32>
    %106 = arith.subf %102, %105 : vector<16x64xf32>
    %107 = math.exp %106 : vector<16x64xf32>
    %cst_52 = arith.constant dense<0.000000e+00> : vector<16x32xf32>
    %108 = tpu.matmul %107, %100, %cst_52 {dimension_numbers = #tpu.dot_dimension_numbers<[1], [0], [0], [1], [0, 0, 1, 1], [], []>} : vector<16x64xf32>, vector<64x32xf32>, vector<16x32xf32> -> vector<16x32xf32>
    %cst_53 = arith.constant dense<0.000000e+00> : vector<16x32xf32>
    %109 = tpu.matmul %107, %11, %cst_53 {dimension_numbers = #tpu.dot_dimension_numbers<[1], [0], [0], [1], [0, 0, 1, 1], [], []>} : vector<16x64xf32>, vector<64x32xf32>, vector<16x32xf32> -> vector<16x32xf32>
    %110 = tpu.reciprocal %109 {approx = true} : vector<16x32xf32> -> vector<16x32xf32>
    %111 = arith.mulf %108, %110 : vector<16x32xf32>
    %cst_54 = arith.constant dense<0.000000e+00> : vector<16x32xf32>
    %112 = tpu.matmul %111, %86, %cst_54 {dimension_numbers = #tpu.dot_dimension_numbers<[1], [0], [0], [1], [0, 0, 1, 1], [], []>} : vector<16x32xf32>, vector<32x32xf32>, vector<16x32xf32> -> vector<16x32xf32>
    %113 = vector.broadcast %87 : vector<1x32xf32> to vector<16x32xf32>
    %114 = arith.addf %112, %113 : vector<16x32xf32>
    %115 = arith.addf %74, %114 : vector<16x32xf32>
    %116 = vector.extract_strided_slice %9 {offsets = [12, 0], sizes = [1, 32], strides = [1, 1]} : vector<16x64xf32> to vector<1x32xf32>
    %117 = vector.extract_strided_slice %9 {offsets = [13, 0], sizes = [1, 32], strides = [1, 1]} : vector<16x64xf32> to vector<1x32xf32>
    %cst_55 = arith.constant dense<0.000000e+00> : vector<16xf32>
    %118 = vector.multi_reduction <add>, %115, %cst_55 [1] : vector<16x32xf32> to vector<16xf32>
    %119 = vector.shape_cast %118 : vector<16xf32> to vector<16x1xf32>
    %cst_56 = arith.constant 3.200000e+01 : f32
    %120 = vector.broadcast %cst_56 : f32 to vector<16x1xf32>
    %121 = arith.divf %119, %120 : vector<16x1xf32>
    %122 = vector.broadcast %121 : vector<16x1xf32> to vector<16x32xf32>
    %123 = arith.subf %115, %122 : vector<16x32xf32>
    %124 = arith.mulf %123, %123 : vector<16x32xf32>
    %cst_57 = arith.constant dense<0.000000e+00> : vector<16xf32>
    %125 = vector.multi_reduction <add>, %124, %cst_57 [1] : vector<16x32xf32> to vector<16xf32>
    %126 = vector.shape_cast %125 : vector<16xf32> to vector<16x1xf32>
    %cst_58 = arith.constant 3.200000e+01 : f32
    %127 = vector.broadcast %cst_58 : f32 to vector<16x1xf32>
    %128 = arith.divf %126, %127 : vector<16x1xf32>
    %cst_59 = arith.constant 9.99999974E-6 : f32
    %129 = vector.broadcast %cst_59 : f32 to vector<16x1xf32>
    %130 = arith.addf %128, %129 : vector<16x1xf32>
    %131 = math.rsqrt %130 : vector<16x1xf32>
    %132 = vector.broadcast %131 : vector<16x1xf32> to vector<16x32xf32>
    %133 = arith.mulf %123, %132 : vector<16x32xf32>
    %134 = vector.broadcast %116 : vector<1x32xf32> to vector<16x32xf32>
    %135 = arith.mulf %133, %134 : vector<16x32xf32>
    %136 = vector.broadcast %117 : vector<1x32xf32> to vector<16x32xf32>
    %137 = arith.addf %135, %136 : vector<16x32xf32>
    %c0_60 = arith.constant 0 : index
    %c0_61 = arith.constant 0 : index
    %138 = vector.load %arg5[%c0_60, %c0_61] : memref<32x64xf32, #tpu.memory_space<vmem>>, vector<32x64xf32>
    %cst_62 = arith.constant dense<0.000000e+00> : vector<16x64xf32>
    %139 = tpu.matmul %137, %138, %cst_62 {dimension_numbers = #tpu.dot_dimension_numbers<[1], [0], [0], [1], [0, 0, 1, 1], [], []>} : vector<16x32xf32>, vector<32x64xf32>, vector<16x64xf32> -> vector<16x64xf32>
    %140 = vector.extract_strided_slice %9 {offsets = [8, 0], sizes = [1, 64], strides = [1, 1]} : vector<16x64xf32> to vector<1x64xf32>
    %141 = vector.broadcast %140 : vector<1x64xf32> to vector<16x64xf32>
    %142 = arith.addf %139, %141 : vector<16x64xf32>
    %cst_63 = arith.constant 0.000000e+00 : f32
    %143 = vector.broadcast %cst_63 : f32 to vector<16x64xf32>
    %144 = arith.maximumf %142, %143 : vector<16x64xf32>
    %c0_64 = arith.constant 0 : index
    %c0_65 = arith.constant 0 : index
    %145 = vector.load %arg6[%c0_64, %c0_65] : memref<64x32xf32, #tpu.memory_space<vmem>>, vector<64x32xf32>
    %cst_66 = arith.constant dense<0.000000e+00> : vector<16x32xf32>
    %146 = tpu.matmul %144, %145, %cst_66 {dimension_numbers = #tpu.dot_dimension_numbers<[1], [0], [0], [1], [0, 0, 1, 1], [], []>} : vector<16x64xf32>, vector<64x32xf32>, vector<16x32xf32> -> vector<16x32xf32>
    %147 = vector.extract_strided_slice %9 {offsets = [9, 0], sizes = [1, 32], strides = [1, 1]} : vector<16x64xf32> to vector<1x32xf32>
    %148 = vector.broadcast %147 : vector<1x32xf32> to vector<16x32xf32>
    %149 = arith.addf %146, %148 : vector<16x32xf32>
    %150 = arith.addf %137, %149 : vector<16x32xf32>
    %151 = vector.extract_strided_slice %9 {offsets = [14, 0], sizes = [1, 32], strides = [1, 1]} : vector<16x64xf32> to vector<1x32xf32>
    %152 = vector.extract_strided_slice %9 {offsets = [15, 0], sizes = [1, 32], strides = [1, 1]} : vector<16x64xf32> to vector<1x32xf32>
    %cst_67 = arith.constant dense<0.000000e+00> : vector<16xf32>
    %153 = vector.multi_reduction <add>, %150, %cst_67 [1] : vector<16x32xf32> to vector<16xf32>
    %154 = vector.shape_cast %153 : vector<16xf32> to vector<16x1xf32>
    %cst_68 = arith.constant 3.200000e+01 : f32
    %155 = vector.broadcast %cst_68 : f32 to vector<16x1xf32>
    %156 = arith.divf %154, %155 : vector<16x1xf32>
    %157 = vector.broadcast %156 : vector<16x1xf32> to vector<16x32xf32>
    %158 = arith.subf %150, %157 : vector<16x32xf32>
    %159 = arith.mulf %158, %158 : vector<16x32xf32>
    %cst_69 = arith.constant dense<0.000000e+00> : vector<16xf32>
    %160 = vector.multi_reduction <add>, %159, %cst_69 [1] : vector<16x32xf32> to vector<16xf32>
    %161 = vector.shape_cast %160 : vector<16xf32> to vector<16x1xf32>
    %cst_70 = arith.constant 3.200000e+01 : f32
    %162 = vector.broadcast %cst_70 : f32 to vector<16x1xf32>
    %163 = arith.divf %161, %162 : vector<16x1xf32>
    %cst_71 = arith.constant 9.99999974E-6 : f32
    %164 = vector.broadcast %cst_71 : f32 to vector<16x1xf32>
    %165 = arith.addf %163, %164 : vector<16x1xf32>
    %166 = math.rsqrt %165 : vector<16x1xf32>
    %167 = vector.broadcast %166 : vector<16x1xf32> to vector<16x32xf32>
    %168 = arith.mulf %158, %167 : vector<16x32xf32>
    %169 = vector.broadcast %151 : vector<1x32xf32> to vector<16x32xf32>
    %170 = arith.mulf %168, %169 : vector<16x32xf32>
    %171 = vector.broadcast %152 : vector<1x32xf32> to vector<16x32xf32>
    %172 = arith.addf %170, %171 : vector<16x32xf32>
    %c0_72 = arith.constant 0 : index
    %c0_73 = arith.constant 0 : index
    %173 = vector.load %arg9[%c0_72, %c0_73] : memref<16x32xf32, #tpu.memory_space<vmem>>, vector<16x32xf32>
    tpu.vector_store %arg9[%c0_72, %c0_73], %172 {strides = array<i32>} : memref<16x32xf32, #tpu.memory_space<vmem>>, vector<16x32xf32>,
    return
  }
  func.func @transform_0(%arg0: i32) -> (i32, i32, i32) {
    %c0_i32 = arith.constant 0 : i32
    %c0_i32_0 = arith.constant 0 : i32
    %c0_i32_1 = arith.constant 0 : i32
    %c0_i32_2 = arith.constant 0 : i32
    return %c0_i32, %c0_i32_0, %c0_i32_1 : i32, i32, i32
  }
  func.func @transform_1(%arg0: i32) -> (i32, i32, i32) {
    %c0_i32 = arith.constant 0 : i32
    %c0_i32_0 = arith.constant 0 : i32
    %c0_i32_1 = arith.constant 0 : i32
    %c0_i32_2 = arith.constant 0 : i32
    return %c0_i32, %c0_i32_0, %c0_i32_1 : i32, i32, i32
  }
  func.func @transform_2(%arg0: i32) -> (i32, i32, i32) {
    %c0_i32 = arith.constant 0 : i32
    %c0_i32_0 = arith.constant 0 : i32
    %c0_i32_1 = arith.constant 0 : i32
    %c0_i32_2 = arith.constant 0 : i32
    return %c0_i32, %c0_i32_0, %c0_i32_1 : i32, i32, i32
  }
  func.func @transform_3(%arg0: i32) -> (i32, i32, i32) {
    %c0_i32 = arith.constant 0 : i32
    %c0_i32_0 = arith.constant 0 : i32
    %c0_i32_1 = arith.constant 0 : i32
    %c0_i32_2 = arith.constant 0 : i32
    return %c0_i32, %c0_i32_0, %c0_i32_1 : i32, i32, i32
  }
  func.func @transform_4(%arg0: i32) -> (i32, i32) {
    %c0_i32 = arith.constant 0 : i32
    %c0_i32_0 = arith.constant 0 : i32
    %c0_i32_1 = arith.constant 0 : i32
    return %c0_i32, %c0_i32_0 : i32, i32
  }
  func.func @transform_5(%arg0: i32) -> (i32, i32) {
    %c0_i32 = arith.constant 0 : i32
    %c0_i32_0 = arith.constant 0 : i32
    %c0_i32_1 = arith.constant 0 : i32
    return %c0_i32, %c0_i32_0 : i32, i32
  }
  func.func @transform_6(%arg0: i32) -> (i32, i32) {
    %c0_i32 = arith.constant 0 : i32
    %c0_i32_0 = arith.constant 0 : i32
    %c0_i32_1 = arith.constant 0 : i32
    return %c0_i32, %c0_i32_0 : i32, i32
  }
  func.func @transform_7(%arg0: i32) -> (i32, i32) {
    %c0_i32 = arith.constant 0 : i32
    %c0_i32_0 = arith.constant 0 : i32
    %c0_i32_1 = arith.constant 0 : i32
    return %c0_i32, %c0_i32_0 : i32, i32
  }
  func.func @transform_8(%arg0: i32) -> (i32, i32) {
    %c0_i32 = arith.constant 0 : i32
    %c0_i32_0 = arith.constant 0 : i32
    %c0_i32_1 = arith.constant 0 : i32
    return %c0_i32, %c0_i32_0 : i32, i32
  }
}

</mosaic_0001>

<bundles_post_ra>
// kernel: transformer_decoder_layer.1
= control target key start
LH: loop header
LB: loop body
LE: loop exit
PB: predicated region body
PF: predicated region fallthrough
CT: control target
= control target key end

     0   :  { %13 = vsyncpa [#allocation3], 0  ;;  %s1460_s0 = inlined_call_operand.vmem [shape: f32[2,16,32], index: 0, kind: input, shape index: {}]   ;;  %s1461_s1 = inlined_call_operand.vmem [shape: f32[2,16,32], index: 1, kind: input, shape index: {}]   ;;  %s1462_s2 = inlined_call_operand.hbm [shape: f32[6,32,32], index: 2, kind: input, shape index: {}]   ;;  %s1463_s3 = inlined_call_operand.vmem [shape: f32[2,32,32], index: 3, kind: input, shape index: {}]   ;;  %s1464_s4 = inlined_call_operand.hbm [shape: f32[32,64], index: 4, kind: input, shape index: {}]   ;;  %s1465_s5 = inlined_call_operand.vmem [shape: f32[64,32], index: 5, kind: input, shape index: {}]   ;;  %s1466_s6 = inlined_call_operand.vmem [shape: f32[16,64], index: 6, kind: input, shape index: {}]   ;;  %s1467_s7 = inlined_call_operand.vmem [shape: f32[80,64], index: 7, kind: input, shape index: {}]   ;;  %s1468_s8 = inlined_call_operand.hbm [shape: f32[16,32], index: 8, kind: output, shape index: {}]  }
   0x1   :  { %14 = vsyncpa [#allocation6], 0 }
   0x2   :  { %15 = vsyncpa [#allocation4], 0  ;;  %s24_s29 = sshll.u32 %s1462_s2, 4  ;;  %s1069_s30 = smov [#allocation2]   ;;  %s25_s29 = int_to_ptr.hbm [resolvable:$true] %s24_s29 }
   0x3   :  { %s26_s9 = sshll.u32 %s1069_s30, 4  ;;  %s39_s12 = sshll.u32 %s1464_s4, 4  ;;  %s27_s9 = int_to_ptr.vmem [resolvable:$true] %s26_s9  ;;  %s40_s12 = int_to_ptr.hbm [resolvable:$true] %s39_s12 }
   0x4   :  { %s1070_s13 = smov 128   ;;  %s1071_s14 = smov 8  }
   0x5   :  { %32 = dma.hbm_to_vmem [thread:$0]  %s25_s29, 3072, %s27_s9, [#allocation3], %s1070_s13, %s1070_s13, %s1071_s14  }
   0x6   :  { %s1072_s15 = smov [#allocation5]  }
   0x7   :  { %s41_s16 = sshll.u32 %s1072_s15, 4  ;;  %s42_s16 = int_to_ptr.vmem [resolvable:$true] %s41_s16 }
   0x8   :  { %47 = dma.hbm_to_vmem [thread:$0]  %s40_s12, 512, %s42_s16, [#allocation6], %s1070_s13, %s1070_s13, %s1071_s14  }
   0x9   :  { %1063 = dma.done.wait [#allocation3], 3072  }
   0xa   :  { %1064 = vsyncadd [#allocation3], 4294964224 }
   0xb   :  { %1065 = dma.done.wait [#allocation6], 512  }
   0xc   :  { %1066 = vsyncadd [#allocation6], 4294966784  ;;  %v96_v0 = vld [vmem:[#allocation2 + $0x38] sm:$0xff]  ;;  %v95_v1 = vld [vmem:[#allocation2 + $0x30] sm:$0xff]  ;;  %vm107_vm0 = vcmask 261120   ;;  %vm266_vm1 = vcmask 523264  }
   0xd   :  { %156 = vmatpush.msra.mxu1 %v96_v0  ;;  %v1135_v2 = vld [vmem:[%s1461_s1] sm:$0xff]  ;;  %v893_v3 = vld [vmem:[%s1461_s1 + $0x10] sm:$0xff]  ;;  %v94_v4 = vld [vmem:[#allocation2 + $0x28] sm:$0xff] }
   0xe   :  { %v91_v5 = vld [vmem:[#allocation2 + $0x18] sm:$0xff]  ;;  %v93_v6 = vld [vmem:[#allocation2 + $0x20] sm:$0xff]  ;;  %v90_v7 = vld [vmem:[#allocation2 + $0x10] sm:$0xff]  ;;  %v1141_v8 = vadd.f32 %v893_v3, %v1135_v2 }
   0xf   :  { %157 = vmatpush.msra.mxu1 %v95_v1  ;;  %126 = vmatpush.msra.mxu0 %v91_v5  ;;  %v89_v9 = vld [vmem:[#allocation2 + $0x8] sm:$0xff]  ;;  %v1146_v10 = vld [vmem:[%s1460_s0] sm:$0xff]  ;;  %v1151_v11 = vld [vmem:[%s1460_s0 + $0x10] sm:$0xff] }
  0x10   :  { %v88_v12 = vld [vmem:[#allocation2] sm:$0xff]  ;;  %v86_v13 = vadd.f32 %v1151_v11, %v1146_v10  ;;  %v1160_v14 = vld [vmem:[%s1461_s1 + $0x8] sm:$0xff]  ;;  %v894_v15 = vld [vmem:[%s1461_s1 + $0x18] sm:$0xff] }
  0x11   :  { %158 = vmatpush.msra.mxu1 %v94_v4  ;;  %127 = vmatpush.msra.mxu0 %v90_v7  ;;  %v1169_v16 = vld [vmem:[%s1460_s0 + $0x8] sm:$0xff]  ;;  %v1174_v17 = vld [vmem:[%s1460_s0 + $0x18] sm:$0xff]  ;;  %v1177_v18 = vadd.f32 %v894_v15, %v1160_v14  ;;  %v1193_v21 = vld [vmem:[%s1467_s7 + $0x40] sm:$0xff] }
  0x12   :  { %v87_v19 = vadd.f32 %v1174_v17, %v1169_v16  ;;  %v1187_v20 = vld [vmem:[%s1467_s7 + $0x48] sm:$0xff]  ;;  %v1199_v22 = vld [vmem:[%s1467_s7 + $0x38] sm:$0xff]  ;;  %v1205_v23 = vld [vmem:[%s1467_s7 + $0x30] sm:$0xff] }
  0x13   :  { %159 = vmatpush.msra.mxu1 %v93_v6  ;;  %128 = vmatpush.msra.mxu0 %v89_v9  ;;  %v1211_v24 = vld [vmem:[%s1467_s7 + $0x28] sm:$0xff]  ;;  %v1217_v25 = vld [vmem:[%s1467_s7 + $0x20] sm:$0xff]  ;;  %v1223_v26 = vld [vmem:[%s1467_s7 + $0x18] sm:$0xff] }
  0x14   :  { %897 = vmatmul.msk.f32.vlgmr.msra.gmra.mxu1 %vm107_vm0, %v1141_v8  ;;  %v1229_v27 = vld [vmem:[%s1467_s7 + $0x10] sm:$0xff]  ;;  %v1235_v29 = vld [vmem:[%s1466_s6] sm:$0xff]  ;;  %v101_v37 = vld [vmem:[#allocation2 + $0x58] sm:$0xff] }
  0x15   :  { %129 = vmatpush.msra.mxu0 %v88_v12  ;;  %316 = vmatpush.msrb.mxu1 %v1187_v20  ;;  %v137_v30 = vperm.slane %v1235_v29, 1  ;;  %v100_v38 = vld [vmem:[#allocation2 + $0x50] sm:$0xff]  ;;  %v99_v39 = vld [vmem:[#allocation2 + $0x48] sm:$0xff]  ;;  %v98_v41 = vld [vmem:[#allocation2 + $0x40] sm:$0xff]  ;;  %v106_v46 = vperm.slane %v1235_v29, 0  ;;  %v167_v52 = vperm.slane %v1235_v29, 2 }
  0x16   :  { %895 = vmatmul.msk.f32.vlgmr.msra.gmra.mxu0 %vm107_vm0, %v86_v13  ;;  %186 = vmatpush.msra.mxu2 %v101_v37  ;;  %v1268_v59 = vld [vmem:[%s1467_s7] sm:$0xff]  ;;  %v1279_v4 = vld [vmem:[%s1467_s7 + $0x8] sm:$0xff] }
  0x17   :  { %317 = vmatpush.msrb.mxu1 %v1193_v21 }
  0x18   :  { %187 = vmatpush.msra.mxu2 %v100_v38 }
  0x19   :  { %318 = vmatpush.msrb.mxu1 %v1199_v22 }
  0x1a   :  { %188 = vmatpush.msra.mxu2 %v99_v39 }
  0x1b   :  { %319 = vmatpush.msrb.mxu1 %v1205_v23 }
  0x1c   :  { %898 = vmatmul.msk.f32.gmra.mxu1 %vm107_vm0, %v1177_v18  ;;  %189 = vmatpush.msra.mxu2 %v98_v41 }
  0x1d   :  { %320 = vmatpush.msrb.mxu1 %v1211_v24  ;;  %899 = vmatmul.msk.f32.vlgmr.msra.gmra.mxu2 %vm107_vm0, %v1135_v2 }
  0x1e   :  { %896 = vmatmul.msk.f32.gmra.mxu0 %vm107_vm0, %v87_v19 }
  0x1f   :  { %321 = vmatpush.msrb.mxu1 %v1217_v25 }
  0x21   :  { %322 = vmatpush.msrb.mxu1 %v1223_v26 }
  0x23   :  { %323 = vmatpush.msrb.mxu1 %v1229_v27 }
  0x25   :  { %900 = vmatmul.msk.f32.gmra.mxu2 %vm107_vm0, %v1160_v14 }
  0x91   :  { %v161_v28 = vpop.f32.mrf.mxu1 }
  0x92   :  { %v162_v33 = vadd.f32 %v161_v28, %v137_v30 }
  0x93   :  { %v131_v45 = vpop.f32.mrf.mxu0 }
  0x94   :  { %v203_v35 = vmul.f32 %v162_v33, %v1193_v21  ;;  %v201_v40 = vmul.f32 %v162_v33, %v1205_v23  ;;  %v199_v43 = vmul.f32 %v162_v33, %v1217_v25  ;;  %v197_v47 = vmul.f32 %v162_v33, %v1229_v27  ;;  %v105_v33 = vld [vmem:[%s1463_s3 + $0x18] sm:$0xff] }
  0x95   :  { %v132_v48 = vadd.f32 %v131_v45, %v106_v46  ;;  %v335_v45 = vperm.slane %v1235_v29, 3 }
  0x99   :  { %v164_v31 = vpop.f32.mrf.mxu1 }
  0x9a   :  { %v165_v32 = vadd.f32 %v164_v31, %v137_v30 }
  0x9b   :  { %v134_v49 = vpop.f32.mrf.mxu0 }
  0x9c   :  { %v204_v34 = vmul.f32 %v165_v32, %v1187_v20  ;;  %v202_v36 = vmul.f32 %v165_v32, %v1199_v22  ;;  %v200_v42 = vmul.f32 %v165_v32, %v1211_v24  ;;  %v198_v44 = vmul.f32 %v165_v32, %v1223_v26 }
  0x9d   :  { %v135_v50 = vadd.f32 %v134_v49, %v106_v46 }
  0x9e   :  { %901 = vmatpush.xpose.msk.msra.mxu3 %vm107_vm0, %v204_v34  ;;  %v104_v34 = vld [vmem:[%s1463_s3 + $0x10] sm:$0xff] }
  0xa0   :  { %v191_v51 = vpop.f32.mrf.mxu2 }
  0xa1   :  { %v192_v53 = vadd.f32 %v191_v51, %v167_v52 }
  0xa2   :  { %902 = vmatpush.xpose.msk.msra.mxu3 %vm107_vm0, %v203_v35  ;;  %v103_v35 = vld [vmem:[%s1463_s3 + $0x8] sm:$0xff] }
  0xa3   :  { %v211_v57 = vmul.f32 %v192_v53, %v1193_v21  ;;  %v209_v60 = vmul.f32 %v192_v53, %v1205_v23  ;;  %v207_v1 = vmul.f32 %v192_v53, %v1217_v25  ;;  %v205_v5 = vmul.f32 %v192_v53, %v1229_v27 }
  0xa6   :  { %903 = vmatpush.xpose.msk.msra.mxu3 %vm107_vm0, %v202_v36  ;;  %v102_v36 = vld [vmem:[%s1463_s3] sm:$0xff] }
  0xa8   :  { %v194_v54 = vpop.f32.mrf.mxu2 }
  0xa9   :  { %v195_v55 = vadd.f32 %v194_v54, %v167_v52  ;;  %v1073_v54 = vmov 32.0  }
  0xaa   :  { %904 = vmatpush.xpose.msk.msra.mxu3 %vm107_vm0, %v201_v40 }
  0xab   :  { %v212_v56 = vmul.f32 %v195_v55, %v1187_v20  ;;  %v210_v58 = vmul.f32 %v195_v55, %v1199_v22  ;;  %v208_v63 = vmul.f32 %v195_v55, %v1211_v24  ;;  %v206_v3 = vmul.f32 %v195_v55, %v1223_v26 }
  0xad   :  { %293 = vmatpush.msrb.mxu0 %v212_v56  ;;  %947 = vmatpush.msrb.mxu2 %v212_v56 }
  0xae   :  { %905 = vmatpush.xpose.msk.msra.mxu3 %vm107_vm0, %v200_v42 }
  0xaf   :  { %294 = vmatpush.msrb.mxu0 %v211_v57  ;;  %948 = vmatpush.msrb.mxu2 %v211_v57  ;;  %v435_v57 = vld [vmem:[#allocation2 + $0x98] sm:$0xff] }
  0xb0   :  { %489 = vmatpush.msra.mxu1 %v435_v57 }
  0xb1   :  { %295 = vmatpush.msrb.mxu0 %v210_v58  ;;  %949 = vmatpush.msrb.mxu2 %v210_v58  ;;  %v434_v58 = vld [vmem:[#allocation2 + $0x90] sm:$0xff] }
  0xb2   :  { %906 = vmatpush.xpose.msk.msra.mxu3 %vm107_vm0, %v199_v43  ;;  %490 = vmatpush.msra.mxu1 %v434_v58 }
  0xb3   :  { %296 = vmatpush.msrb.mxu0 %v209_v60  ;;  %950 = vmatpush.msrb.mxu2 %v209_v60 }
  0xb5   :  { %297 = vmatpush.msrb.mxu0 %v208_v63  ;;  %951 = vmatpush.msrb.mxu2 %v208_v63 }
  0xb6   :  { %907 = vmatpush.xpose.msk.msra.mxu3 %vm107_vm0, %v198_v44 }
  0xb7   :  { %298 = vmatpush.msrb.mxu0 %v207_v1  ;;  %952 = vmatpush.msrb.mxu2 %v207_v1 }
  0xb9   :  { %299 = vmatpush.msrb.mxu0 %v206_v3  ;;  %953 = vmatpush.msrb.mxu2 %v206_v3 }
  0xba   :  { %908 = vmatpush.xpose.msk.msra.mxu3 %vm107_vm0, %v197_v47 }
  0xbb   :  { %300 = vmatpush.msrb.mxu0 %v205_v5  ;;  %954 = vmatpush.msrb.mxu2 %v205_v5 }
  0xbd   :  { %909 = vmatmul.msk.f32.vlgmr.msra.gmra.mxu3 %vm107_vm0, %v132_v48  ;;  %354 = vmatpush.msra.mxu2 %v105_v33 }
  0xbf   :  { %355 = vmatpush.msra.mxu2 %v104_v34 }
  0xc1   :  { %356 = vmatpush.msra.mxu2 %v103_v35 }
  0xc3   :  { %357 = vmatpush.msra.mxu2 %v102_v36 }
  0xc5   :  { %910 = vmatmul.msk.f32.gmra.mxu3 %vm107_vm0, %v135_v50 }
 0x140   :  { %v260_v61 = vpop.f32.mrf.mxu3 }
 0x141   :  { %v261_v62 = vadd.f32 %v260_v61, %v1268_v59  ;;  %v433_v61 = vld [vmem:[#allocation2 + $0x88] sm:$0xff] }
 0x142   :  { %491 = vmatpush.msra.mxu1 %v433_v61 }
 0x143   :  { %v267_v0 = vsel %vm266_vm1, %v261_v62, -inf }
 0x144   :  { %268 = vmax.xlane.f32.xlu0 %v267_v0 }
 0x148   :  { %v263_v6 = vpop.f32.mrf.mxu3 }
 0x149   :  { %v264_v7 = vadd.f32 %v263_v6, %v1279_v4 }
 0x14b   :  { %v270_v9 = vsel %vm266_vm1, %v264_v7, -inf }
 0x14c   :  { %271 = vmax.xlane.f32.xlu0 %v270_v9 }
 0x1b7   :  { %v269_v12 = vpop.xlane.xlu0 %268 }
 0x1b8   :  { %v273_v13 = vsub.f32 %v261_v62, %v269_v12 }
 0x1ba   :  { %v275_v15 = vmul.f32 1.442695, %v273_v13  ;;  %v430_v13 = vld [vmem:[#allocation2 + $0x78] sm:$0xff] }
 0x1bb   :  { %465 = vmatpush.msra.mxu0 %v430_v13  ;;  %v439_v13 = vld [vmem:[#allocation2 + $0xb0] sm:$0xff] }
 0x1bc   :  { %961 = vpow2.f32 %v275_v15  ;;  %v429_v15 = vld [vmem:[#allocation2 + $0x70] sm:$0xff] }
 0x1bd   :  { %466 = vmatpush.msra.mxu0 %v429_v15  ;;  %v438_v15 = vld [vmem:[#allocation2 + $0xa8] sm:$0xff] }
 0x1bf   :  { %v272_v19 = vpop.xlane.xlu0 %271 }
 0x1c0   :  { %v274_v28 = vsub.f32 %v264_v7, %v272_v19  ;;  %v428_v19 = vld [vmem:[#allocation2 + $0x68] sm:$0xff] }
 0x1c1   :  { %467 = vmatpush.msra.mxu0 %v428_v19  ;;  %v437_v19 = vld [vmem:[#allocation2 + $0xa0] sm:$0xff] }
 0x1c2   :  { %v962_v30 = vpop.eup %961  ;;  %v277_v31 = vmul.f32 1.442695, %v274_v28  ;;  %v427_v28 = vld [vmem:[#allocation2 + $0x60] sm:$0xff] }
 0x1c3   :  { %911 = vmatmul.msk.f32.vlgmr.msrb.gmra.mxu0 %vm266_vm1, %v962_v30  ;;  %913 = vmatmul.msk.f32.vlgmr.msrb.gmra.mxu1 %vm266_vm1, %v962_v30 }
 0x1c4   :  { %963 = vpow2.f32 %v277_v31  ;;  %468 = vmatpush.msra.mxu0 %v427_v28 }
 0x1ca   :  { %v964_v32 = vpop.eup %963 }
 0x1cb   :  { %912 = vmatmul.msk.f32.vlgmr.msrb.gmra.mxu2 %vm266_vm1, %v964_v32  ;;  %914 = vmatmul.msk.f32.gmra.mxu1 %vm266_vm1, %v964_v32 }
 0x240   :  { %v325_v37 = vpop.f32.mrf.mxu1  ;;  %v302_v39 = vpop.f32.mrf.mxu0 }
 0x241   :  { %965 = vrcp.f32 %v325_v37 }
 0x247   :  { %v966_v38 = vpop.eup %965 }
 0x248   :  { %v333_v40 = vmul.f32 %v966_v38, %v302_v39  ;;  %v328_v41 = vpop.f32.mrf.mxu1  ;;  %v476_v39 = vperm.slane %v1235_v29, 5 }
 0x249   :  { %967 = vrcp.f32 %v328_v41 }
 0x24a   :  { %915 = vmatmul.msk.f32.vlgmr.msra.gmra.mxu2 %vm107_vm0, %v333_v40  ;;  %969 = vrcp.f32 %v1073_v54 }
 0x24e   :  { %v305_v42 = vpop.f32.mrf.mxu2 }
 0x24f   :  { %v968_v43 = vpop.eup %967 }
 0x250   :  { %v334_v44 = vmul.f32 %v968_v43, %v305_v42  ;;  %v970_v55 = vpop.eup %969 }
 0x251   :  { %v374_v56 = vmul.f32 32.0, %v970_v55  ;;  %vm378_vm2 = vweird.f32 %v970_v55 }
 0x252   :  { %916 = vmatmul.msk.f32.gmra.mxu2 %vm107_vm0, %v334_v44 }
 0x253   :  { %v375_v60 = vsub.f32 1.0, %v374_v56 }
 0x255   :  { %v376_v62 = vmul.f32 %v970_v55, %v375_v60 }
 0x2cd   :  { %v359_v46 = vpop.f32.mrf.mxu2 }
 0x2ce   :  { %v360_v47 = vadd.f32 %v359_v46, %v335_v45 }
 0x2d0   :  { %v365_v48 = vadd.f32 %v360_v47, %v1146_v10  ;;  %v432_v10 = vld [vmem:[#allocation2 + $0x80] sm:$0xff] }
 0x2d1   :  { %492 = vmatpush.msra.mxu1 %v432_v10 }
 0x2d2   :  { %v367_v49 = vsel %vm107_vm0, %v365_v48, 0.0  ;;  %923 = vmatmul.msk.f32.vlgmr.msra.gmra.mxu1 %vm107_vm0, %v1141_v8 }
 0x2d3   :  { %368 = vadd.xlane.f32.xlu1 %v367_v49  ;;  %642 = vmatpush.msrb.mxu1 %v1187_v20 }
 0x2d5   :  { %v362_v50 = vpop.f32.mrf.mxu2  ;;  %643 = vmatpush.msrb.mxu1 %v1193_v21 }
 0x2d6   :  { %v363_v51 = vadd.f32 %v362_v50, %v335_v45  ;;  %v1331_v45 = vld [vmem:[%s1466_s6 + $0x8] sm:$0xff]  ;;  %s877_s6 = sshll.u32 %s1468_s8, 4  ;;  %s878_s6 = int_to_ptr.hbm [resolvable:$true] %s877_s6 }
 0x2d7   :  { %644 = vmatpush.msrb.mxu1 %v1199_v22 }
 0x2d8   :  { %v366_v52 = vadd.f32 %v363_v51, %v1169_v16  ;;  %v377_v16 = vadd.f32 %v970_v55, %v376_v62 }
 0x2d9   :  { %645 = vmatpush.msrb.mxu1 %v1205_v23 }
 0x2da   :  { %v370_v53 = vsel %vm107_vm0, %v366_v52, 0.0  ;;  %v1312_v63 = vsel %vm378_vm2, %v970_v55, %v377_v16  ;;  %924 = vmatmul.msk.f32.gmra.mxu1 %vm107_vm0, %v1177_v18  ;;  %v421_v55 = vperm.slane %v1331_v45, 3 }
 0x2db   :  { %371 = vadd.xlane.f32.xlu1 %v370_v53  ;;  %646 = vmatpush.msrb.mxu1 %v1211_v24 }
 0x2dd   :  { %647 = vmatpush.msrb.mxu1 %v1217_v25 }
 0x2df   :  { %648 = vmatpush.msrb.mxu1 %v1223_v26 }
 0x2e1   :  { %649 = vmatpush.msrb.mxu1 %v1229_v27 }
 0x346   :  { %v369_v0 = vpop.xlane.xlu1 %368 }
 0x347   :  { %v380_v1 = vmul.f32 %v1312_v63, %v369_v0 }
 0x349   :  { %v382_v8 = vsub.f32 %v365_v48, %v380_v1 }
 0x34b   :  { %v384_v3 = vmul.f32 %v382_v8, %v382_v8 }
 0x34d   :  { %v386_v5 = vsel %vm107_vm0, %v384_v3, 0.0 }
 0x34e   :  { %387 = vadd.xlane.f32.xlu2 %v386_v5  ;;  %v372_v6 = vpop.xlane.xlu1 %371 }
 0x34f   :  { %v381_v7 = vmul.f32 %v1312_v63, %v372_v6  ;;  %v494_v33 = vpop.f32.mrf.mxu1 }
 0x350   :  { %v495_v43 = vadd.f32 %v494_v33, %v476_v39 }
 0x351   :  { %v383_v9 = vsub.f32 %v366_v52, %v381_v7  ;;  %v418_v52 = vperm.slane %v1331_v45, 2 }
 0x352   :  { %v530_v51 = vmul.f32 %v495_v43, %v1193_v21  ;;  %v528_v16 = vmul.f32 %v495_v43, %v1205_v23  ;;  %v526_v7 = vmul.f32 %v495_v43, %v1217_v25 }
 0x353   :  { %v385_v18 = vmul.f32 %v383_v9, %v383_v9 }
 0x355   :  { %v389_v12 = vsel %vm107_vm0, %v385_v18, 0.0 }
 0x356   :  { %390 = vadd.xlane.f32.xlu2 %v389_v12  ;;  %v440_v12 = vld [vmem:[#allocation2 + $0xb8] sm:$0xff] }
 0x357   :  { %v497_v41 = vpop.f32.mrf.mxu1  ;;  %513 = vmatpush.msrb.mxu2 %v440_v12 }
 0x358   :  { %v498_v44 = vadd.f32 %v497_v41, %v476_v39 }
 0x359   :  { %514 = vmatpush.msrb.mxu2 %v439_v13 }
 0x35a   :  { %v531_v47 = vmul.f32 %v498_v44, %v1187_v20  ;;  %v529_v58 = vmul.f32 %v498_v44, %v1199_v22  ;;  %v527_v3 = vmul.f32 %v498_v44, %v1211_v24 }
 0x35b   :  { %515 = vmatpush.msrb.mxu2 %v438_v15 }
 0x35c   :  { %927 = vmatpush.xpose.msk.msrb.mxu3 %vm107_vm0, %v531_v47 }
 0x35d   :  { %516 = vmatpush.msrb.mxu2 %v437_v19 }
 0x35e   :  { %925 = vmatmul.msk.f32.vlgmr.msrb.gmra.mxu2 %vm107_vm0, %v1135_v2 }
 0x360   :  { %928 = vmatpush.xpose.msk.msrb.mxu3 %vm107_vm0, %v530_v51  ;;  %v918_v51 = vld [vmem:[%s1463_s3 + $0x28] sm:$0xff] }
 0x364   :  { %929 = vmatpush.xpose.msk.msrb.mxu3 %vm107_vm0, %v529_v58 }
 0x366   :  { %926 = vmatmul.msk.f32.gmra.mxu2 %vm107_vm0, %v1160_v14 }
 0x368   :  { %930 = vmatpush.xpose.msk.msrb.mxu3 %vm107_vm0, %v528_v16 }
 0x36c   :  { %931 = vmatpush.xpose.msk.msrb.mxu3 %vm107_vm0, %v527_v3 }
 0x370   :  { %932 = vmatpush.xpose.msk.msrb.mxu3 %vm107_vm0, %v526_v7 }
 0x3c1   :  { %v388_v30 = vpop.xlane.xlu2 %387 }
 0x3c2   :  { %v392_v31 = vmul.f32 %v388_v30, %v1312_v63 }
 0x3c4   :  { %v394_v32 = vadd.f32 1e-05, %v392_v31 }
 0x3c6   :  { %971 = vrsqrt.f32 %v394_v32  ;;  %vm402_vm4 = vweird.f32 %v394_v32 }
 0x3c9   :  { %v391_v34 = vpop.xlane.xlu2 %390 }
 0x3ca   :  { %v393_v35 = vmul.f32 %v391_v34, %v1312_v63  ;;  %v500_v34 = vperm.slane %v1235_v29, 6 }
 0x3cc   :  { %v972_v36 = vpop.eup %971  ;;  %v395_v37 = vadd.f32 1e-05, %v393_v35 }
 0x3cd   :  { %v397_v38 = vmul.f32 %v972_v36, %v394_v32  ;;  %vm403_vm3 = vweird.f32 %v972_v36 }
 0x3ce   :  { %973 = vrsqrt.f32 %v395_v37  ;;  %vm404_vm5 = vmor %vm402_vm4, %vm403_vm3  ;;  %vm412_vm7 = vweird.f32 %v395_v37 }
 0x3cf   :  { %v398_v40 = vmul.f32 %v972_v36, %v397_v38 }
 0x3d1   :  { %v399_v42 = vmul.f32 0.5, %v398_v40 }
 0x3d3   :  { %v400_v46 = vsub.f32 1.5, %v399_v42 }
 0x3d4   :  { %v974_v48 = vpop.eup %973 }
 0x3d5   :  { %v401_v49 = vmul.f32 %v972_v36, %v400_v46  ;;  %v407_v50 = vmul.f32 %v974_v48, %v395_v37  ;;  %vm413_vm6 = vweird.f32 %v974_v48 }
 0x3d6   :  { %vm414_vm8 = vmor %vm412_vm7, %vm413_vm6 }
 0x3d7   :  { %v405_v53 = vsel %vm404_vm5, %v972_v36, %v401_v49  ;;  %v408_v54 = vmul.f32 %v974_v48, %v407_v50 }
 0x3d8   :  { %v416_v56 = vmul.f32 %v405_v53, %v382_v8 }
 0x3d9   :  { %v409_v57 = vmul.f32 0.5, %v408_v54 }
 0x3da   :  { %v419_v60 = vmul.f32 %v418_v52, %v416_v56 }
 0x3db   :  { %v410_v61 = vsub.f32 1.5, %v409_v57 }
 0x3dc   :  { %v1340_v10 = vadd.f32 %v421_v55, %v419_v60 }
 0x3dd   :  { %v411_v62 = vmul.f32 %v974_v48, %v410_v61 }
 0x3de   :  { %v424_v0 = vadd.f32 %v1151_v11, %v1340_v10  ;;  %v525_v11 = vmul.f32 %v498_v44, %v1223_v26 }
 0x3df   :  { %v415_v1 = vsel %vm414_vm8, %v974_v48, %v411_v62  ;;  %v661_v62 = vperm.slane %v1235_v29, 7 }
 0x3e0   :  { %v417_v8 = vmul.f32 %v415_v1, %v383_v9  ;;  %921 = vmatmul.msk.f32.vlgmr.msra.gmra.mxu0 %vm107_vm0, %v424_v0  ;;  %933 = vmatpush.xpose.msk.msrb.mxu3 %vm107_vm0, %v525_v11  ;;  %v524_v9 = vmul.f32 %v495_v43, %v1229_v27 }
 0x3e1   :  { %v518_v33 = vpop.f32.mrf.mxu2 }
 0x3e2   :  { %v420_v5 = vmul.f32 %v418_v52, %v417_v8  ;;  %v519_v35 = vadd.f32 %v518_v33, %v500_v34  ;;  %v917_v52 = vld [vmem:[%s1463_s3 + $0x20] sm:$0xff] }
 0x3e4   :  { %v1349_v6 = vadd.f32 %v421_v55, %v420_v5  ;;  %934 = vmatpush.xpose.msk.msrb.mxu3 %vm107_vm0, %v524_v9  ;;  %v538_v14 = vmul.f32 %v519_v35, %v1193_v21  ;;  %v536_v39 = vmul.f32 %v519_v35, %v1205_v23  ;;  %v534_v44 = vmul.f32 %v519_v35, %v1217_v25  ;;  %v919_v25 = vld [vmem:[%s1463_s3 + $0x30] sm:$0xff] }
 0x3e5   :  { %v532_v21 = vmul.f32 %v519_v35, %v1229_v27 }
 0x3e6   :  { %v425_v18 = vadd.f32 %v1174_v17, %v1349_v6  ;;  %v446_v17 = vperm.slane %v1235_v29, 4 }
 0x3e8   :  { %922 = vmatmul.msk.f32.gmra.mxu0 %vm107_vm0, %v425_v18 }
 0x3e9   :  { %v521_v36 = vpop.f32.mrf.mxu2 }
 0x3ea   :  { %v522_v37 = vadd.f32 %v521_v36, %v500_v34  ;;  %v786_v36 = vld [vmem:[%s1465_s5 + $0x38] sm:$0xff] }
 0x3eb   :  { %802 = vmatpush.msra.mxu1 %v786_v36 }
 0x3ec   :  { %v539_v2 = vmul.f32 %v522_v37, %v1187_v20  ;;  %v537_v38 = vmul.f32 %v522_v37, %v1199_v22  ;;  %v535_v42 = vmul.f32 %v522_v37, %v1211_v24  ;;  %v533_v20 = vmul.f32 %v522_v37, %v1223_v26  ;;  %v920_v24 = vld [vmem:[%s1463_s3 + $0x38] sm:$0xff]  ;;  %v785_v37 = vld [vmem:[%s1465_s5 + $0x30] sm:$0xff] }
 0x3ed   :  { %680 = vmatpush.msra.mxu2 %v920_v24  ;;  %803 = vmatpush.msra.mxu1 %v785_v37 }
 0x3ee   :  { %619 = vmatpush.msrb.mxu0 %v539_v2  ;;  %v784_v2 = vld [vmem:[%s1465_s5 + $0x28] sm:$0xff] }
 0x3ef   :  { %681 = vmatpush.msra.mxu2 %v919_v25  ;;  %804 = vmatpush.msra.mxu1 %v784_v2  ;;  %v737_v25 = vperm.slane %v1331_v45, 4 }
 0x3f0   :  { %620 = vmatpush.msrb.mxu0 %v538_v14 }
 0x3f1   :  { %682 = vmatpush.msra.mxu2 %v918_v51 }
 0x3f2   :  { %621 = vmatpush.msrb.mxu0 %v537_v38 }
 0x3f3   :  { %683 = vmatpush.msra.mxu2 %v917_v52 }
 0x3f4   :  { %622 = vmatpush.msrb.mxu0 %v536_v39  ;;  %v783_v39 = vld [vmem:[%s1465_s5 + $0x20] sm:$0xff] }
 0x3f5   :  { %805 = vmatpush.msra.mxu1 %v783_v39 }
 0x3f6   :  { %623 = vmatpush.msrb.mxu0 %v535_v42  ;;  %v782_v42 = vld [vmem:[%s1465_s5 + $0x18] sm:$0xff] }
 0x3f7   :  { %806 = vmatpush.msra.mxu1 %v782_v42 }
 0x3f8   :  { %624 = vmatpush.msrb.mxu0 %v534_v44  ;;  %v781_v44 = vld [vmem:[%s1465_s5 + $0x10] sm:$0xff] }
 0x3f9   :  { %807 = vmatpush.msra.mxu1 %v781_v44 }
 0x3fa   :  { %625 = vmatpush.msrb.mxu0 %v533_v20 }
 0x3fc   :  { %626 = vmatpush.msrb.mxu0 %v532_v21 }
 0x45d   :  { %v470_v28 = vpop.f32.mrf.mxu0 }
 0x45e   :  { %v471_v30 = vadd.f32 %v470_v28, %v446_v17 }
 0x460   :  { %935 = vmatmul.msk.f32.vlgmr.msrb.gmra.mxu3 %vm107_vm0, %v471_v30  ;;  %v745_v30 = vld [vmem:[#allocation5 + $0x10] sm:$0xff] }
 0x465   :  { %v473_v31 = vpop.f32.mrf.mxu0 }
 0x466   :  { %v474_v32 = vadd.f32 %v473_v31, %v446_v17  ;;  %v744_v31 = vld [vmem:[#allocation5 + $0x8] sm:$0xff] }
 0x468   :  { %936 = vmatmul.msk.f32.gmra.mxu3 %vm107_vm0, %v474_v32  ;;  %v743_v32 = vld [vmem:[#allocation5] sm:$0xff] }
 0x4e3   :  { %v587_v40 = vpop.f32.mrf.mxu3 }
 0x4e4   :  { %v588_v41 = vadd.f32 %v587_v40, %v1268_v59 }
 0x4e6   :  { %v593_v43 = vsel %vm266_vm1, %v588_v41, -inf }
 0x4e7   :  { %594 = vmax.xlane.f32.xlu0 %v593_v43 }
 0x4eb   :  { %v590_v22 = vpop.f32.mrf.mxu3 }
 0x4ec   :  { %v591_v23 = vadd.f32 %v590_v22, %v1279_v4 }
 0x4ee   :  { %v596_v59 = vsel %vm266_vm1, %v591_v23, -inf }
 0x4ef   :  { %597 = vmax.xlane.f32.xlu1 %v596_v59 }
 0x55a   :  { %v595_v26 = vpop.xlane.xlu0 %594 }
 0x55b   :  { %v599_v27 = vsub.f32 %v588_v41, %v595_v26 }
 0x55d   :  { %v601_v46 = vmul.f32 1.442695, %v599_v27 }
 0x55f   :  { %975 = vpow2.f32 %v601_v46 }
 0x562   :  { %v598_v4 = vpop.xlane.xlu1 %597 }
 0x563   :  { %v600_v47 = vsub.f32 %v591_v23, %v598_v4  ;;  %v740_v4 = vperm.slane %v1331_v45, 5 }
 0x565   :  { %v976_v48 = vpop.eup %975  ;;  %v603_v49 = vmul.f32 1.442695, %v600_v47 }
 0x566   :  { %937 = vmatmul.msk.f32.vlgmr.msrb.gmra.mxu0 %vm266_vm1, %v976_v48  ;;  %939 = vmatmul.msk.f32.vlgmr.msrb.gmra.mxu1 %vm266_vm1, %v976_v48 }
 0x567   :  { %977 = vpow2.f32 %v603_v49 }
 0x56d   :  { %v978_v50 = vpop.eup %977 }
 0x56e   :  { %938 = vmatmul.msk.f32.gmra.mxu0 %vm266_vm1, %v978_v50  ;;  %940 = vmatmul.msk.f32.gmra.mxu1 %vm266_vm1, %v978_v50 }
 0x5e3   :  { %v651_v53 = vpop.f32.mrf.mxu1  ;;  %v628_v54 = vpop.f32.mrf.mxu0 }
 0x5e4   :  { %979 = vrcp.f32 %v651_v53 }
 0x5ea   :  { %v980_v55 = vpop.eup %979 }
 0x5eb   :  { %v659_v56 = vmul.f32 %v980_v55, %v628_v54  ;;  %v654_v57 = vpop.f32.mrf.mxu1  ;;  %v631_v60 = vpop.f32.mrf.mxu0 }
 0x5ec   :  { %981 = vrcp.f32 %v654_v57  ;;  %v779_v57 = vld [vmem:[%s1465_s5] sm:$0xff] }
 0x5ed   :  { %941 = vmatmul.msk.f32.vlgmr.msra.gmra.mxu2 %vm107_vm0, %v659_v56  ;;  %v780_v56 = vld [vmem:[%s1465_s5 + $0x8] sm:$0xff]  ;;  %s1074_s5 = smov [#allocation7]  }
 0x5ee   :  { %808 = vmatpush.msra.mxu1 %v780_v56  ;;  %s875_s11 = sshll.u32 %s1074_s5, 4  ;;  %s876_s11 = int_to_ptr.vmem [resolvable:$true] %s875_s11 }
 0x5f0   :  { %809 = vmatpush.msra.mxu1 %v779_v57 }
 0x5f2   :  { %v982_v58 = vpop.eup %981 }
 0x5f3   :  { %v660_v61 = vmul.f32 %v982_v58, %v631_v60  ;;  %v747_v58 = vperm.slane %v1331_v45, 0 }
 0x5f5   :  { %942 = vmatmul.msk.f32.gmra.mxu2 %vm107_vm0, %v660_v61 }
 0x670   :  { %v685_v16 = vpop.f32.mrf.mxu2 }
 0x671   :  { %v686_v0 = vadd.f32 %v685_v16, %v661_v62 }
 0x673   :  { %v691_v1 = vadd.f32 %v686_v0, %v1340_v10 }
 0x675   :  { %v693_v8 = vsel %vm107_vm0, %v691_v1, 0.0 }
 0x676   :  { %694 = vadd.xlane.f32.xlu2 %v693_v8  ;;  %v787_v8 = vperm.slane %v1331_v45, 1 }
 0x678   :  { %v688_v3 = vpop.f32.mrf.mxu2 }
 0x679   :  { %v689_v5 = vadd.f32 %v688_v3, %v661_v62 }
 0x67b   :  { %v692_v7 = vadd.f32 %v689_v5, %v1349_v6  ;;  %v746_v6 = vld [vmem:[#allocation5 + $0x18] sm:$0xff] }
 0x67c   :  { %766 = vmatpush.msra.mxu0 %v746_v6 }
 0x67d   :  { %v696_v18 = vsel %vm107_vm0, %v692_v7, 0.0 }
 0x67e   :  { %697 = vadd.xlane.f32.xlu0 %v696_v18  ;;  %767 = vmatpush.msra.mxu0 %v745_v30 }
 0x680   :  { %768 = vmatpush.msra.mxu0 %v744_v31 }
 0x682   :  { %769 = vmatpush.msra.mxu0 %v743_v32 }
 0x6e9   :  { %v695_v11 = vpop.xlane.xlu2 %694 }
 0x6ea   :  { %v699_v9 = vmul.f32 %v695_v11, %v1312_v63 }
 0x6ec   :  { %v701_v12 = vsub.f32 %v691_v1, %v699_v9 }
 0x6ee   :  { %v703_v13 = vmul.f32 %v701_v12, %v701_v12 }
 0x6f0   :  { %v705_v29 = vsel %vm107_vm0, %v703_v13, 0.0 }
 0x6f1   :  { %706 = vadd.xlane.f32.xlu1 %v705_v29  ;;  %v698_v15 = vpop.xlane.xlu0 %697 }
 0x6f2   :  { %v700_v10 = vmul.f32 %v698_v15, %v1312_v63 }
 0x6f4   :  { %v702_v19 = vsub.f32 %v692_v7, %v700_v10 }
 0x6f6   :  { %v704_v17 = vmul.f32 %v702_v19, %v702_v19 }
 0x6f8   :  { %v708_v28 = vsel %vm107_vm0, %v704_v17, 0.0 }
 0x6f9   :  { %709 = vadd.xlane.f32.xlu2 %v708_v28 }
 0x764   :  { %v707_v33 = vpop.xlane.xlu1 %706 }
 0x765   :  { %v711_v34 = vmul.f32 %v707_v33, %v1312_v63 }
 0x767   :  { %v713_v35 = vadd.f32 1e-05, %v711_v34 }
 0x769   :  { %983 = vrsqrt.f32 %v713_v35  ;;  %vm721_vm10 = vweird.f32 %v713_v35 }
 0x76c   :  { %v710_v14 = vpop.xlane.xlu2 %709 }
 0x76d   :  { %v712_v38 = vmul.f32 %v710_v14, %v1312_v63 }
 0x76f   :  { %v984_v40 = vpop.eup %983  ;;  %v714_v41 = vadd.f32 1e-05, %v712_v38 }
 0x770   :  { %v716_v43 = vmul.f32 %v984_v40, %v713_v35  ;;  %vm722_vm9 = vweird.f32 %v984_v40 }
 0x771   :  { %985 = vrsqrt.f32 %v714_v41  ;;  %vm723_vm11 = vmor %vm721_vm10, %vm722_vm9  ;;  %vm731_vm13 = vweird.f32 %v714_v41 }
 0x772   :  { %v717_v20 = vmul.f32 %v984_v40, %v716_v43 }
 0x774   :  { %v718_v21 = vmul.f32 0.5, %v717_v20  ;;  %v863_v20 = vperm.slane %v1331_v45, 6 }
 0x776   :  { %v719_v22 = vsub.f32 1.5, %v718_v21 }
 0x777   :  { %v986_v23 = vpop.eup %985 }
 0x778   :  { %v720_v59 = vmul.f32 %v984_v40, %v719_v22  ;;  %v726_v24 = vmul.f32 %v986_v23, %v714_v41  ;;  %vm732_vm12 = vweird.f32 %v986_v23 }
 0x779   :  { %vm733_vm14 = vmor %vm731_vm13, %vm732_vm12 }
 0x77a   :  { %v724_v26 = vsel %vm723_vm11, %v984_v40, %v720_v59  ;;  %v727_v27 = vmul.f32 %v986_v23, %v726_v24 }
 0x77b   :  { %v735_v46 = vmul.f32 %v724_v26, %v701_v12 }
 0x77c   :  { %v728_v47 = vmul.f32 0.5, %v727_v27 }
 0x77d   :  { %v738_v48 = vmul.f32 %v737_v25, %v735_v46 }
 0x77e   :  { %v729_v49 = vsub.f32 1.5, %v728_v47 }
 0x77f   :  { %v741_v50 = vadd.f32 %v740_v4, %v738_v48 }
 0x780   :  { %v730_v51 = vmul.f32 %v986_v23, %v729_v49 }
 0x781   :  { %943 = vmatmul.msk.f32.vlgmr.msra.gmra.mxu0 %vm107_vm0, %v741_v50 }
 0x782   :  { %v734_v52 = vsel %vm733_vm14, %v986_v23, %v730_v51 }
 0x783   :  { %v736_v53 = vmul.f32 %v734_v52, %v702_v19 }
 0x785   :  { %v739_v54 = vmul.f32 %v737_v25, %v736_v53 }
 0x787   :  { %v742_v55 = vadd.f32 %v740_v4, %v739_v54 }
 0x789   :  { %944 = vmatmul.msk.f32.gmra.mxu0 %vm107_vm0, %v742_v55 }
 0x7fe   :  { %v771_v60 = vpop.f32.mrf.mxu0 }
 0x7ff   :  { %v772_v61 = vadd.f32 %v771_v60, %v747_v58 }
 0x801   :  { %v777_v62 = vmax.f32 %v772_v61, 0.0 }
 0x803   :  { %945 = vmatmul.msk.f32.vlgmr.msra.gmra.mxu1 %vm266_vm1, %v777_v62 }
 0x806   :  { %v774_v16 = vpop.f32.mrf.mxu0 }
 0x807   :  { %v775_v0 = vadd.f32 %v774_v16, %v747_v58 }
 0x809   :  { %v778_v1 = vmax.f32 %v775_v0, 0.0 }
 0x80b   :  { %946 = vmatmul.msk.f32.gmra.mxu1 %vm266_vm1, %v778_v1 }
 0x880   :  { %v811_v3 = vpop.f32.mrf.mxu1 }
 0x881   :  { %v812_v5 = vadd.f32 %v811_v3, %v787_v8 }
 0x883   :  { %v817_v7 = vadd.f32 %v812_v5, %v741_v50 }
 0x885   :  { %v819_v18 = vsel %vm107_vm0, %v817_v7, 0.0 }
 0x886   :  { %820 = vadd.xlane.f32.xlu0 %v819_v18 }
 0x888   :  { %v814_v11 = vpop.f32.mrf.mxu1 }
 0x889   :  { %v815_v9 = vadd.f32 %v814_v11, %v787_v8 }
 0x88b   :  { %v818_v12 = vadd.f32 %v815_v9, %v742_v55 }
 0x88d   :  { %v822_v13 = vsel %vm107_vm0, %v818_v12, 0.0 }
 0x88e   :  { %823 = vadd.xlane.f32.xlu1 %v822_v13 }
 0x8f9   :  { %v821_v29 = vpop.xlane.xlu0 %820 }
 0x8fa   :  { %v825_v15 = vmul.f32 %v821_v29, %v1312_v63 }
 0x8fc   :  { %v827_v10 = vsub.f32 %v817_v7, %v825_v15 }
 0x8fe   :  { %v829_v19 = vmul.f32 %v827_v10, %v827_v10 }
 0x900   :  { %v831_v17 = vsel %vm107_vm0, %v829_v19, 0.0 }
 0x901   :  { %v824_v28 = vpop.xlane.xlu1 %823  ;;  %832 = vadd.xlane.f32.xlu2 %v831_v17 }
 0x902   :  { %v826_v6 = vmul.f32 %v824_v28, %v1312_v63 }
 0x904   :  { %v828_v30 = vsub.f32 %v818_v12, %v826_v6 }
 0x906   :  { %v830_v31 = vmul.f32 %v828_v30, %v828_v30 }
 0x908   :  { %v834_v32 = vsel %vm107_vm0, %v830_v31, 0.0 }
 0x909   :  { %835 = vadd.xlane.f32.xlu0 %v834_v32 }
 0x974   :  { %v833_v33 = vpop.xlane.xlu2 %832 }
 0x975   :  { %v837_v34 = vmul.f32 %v833_v33, %v1312_v63 }
 0x977   :  { %v839_v35 = vadd.f32 1e-05, %v837_v34 }
 0x979   :  { %987 = vrsqrt.f32 %v839_v35  ;;  %vm847_vm1 = vweird.f32 %v839_v35 }
 0x97c   :  { %v836_v36 = vpop.xlane.xlu0 %835 }
 0x97d   :  { %v838_v37 = vmul.f32 %v836_v36, %v1312_v63  ;;  %v866_v63 = vperm.slane %v1331_v45, 7 }
 0x97f   :  { %v988_v2 = vpop.eup %987  ;;  %v840_v14 = vadd.f32 1e-05, %v838_v37 }
 0x980   :  { %v842_v38 = vmul.f32 %v988_v2, %v839_v35  ;;  %vm848_vm15 = vweird.f32 %v988_v2 }
 0x981   :  { %989 = vrsqrt.f32 %v840_v14  ;;  %vm849_vm2 = vmor %vm847_vm1, %vm848_vm15  ;;  %vm857_vm4 = vweird.f32 %v840_v14 }
 0x982   :  { %v843_v39 = vmul.f32 %v988_v2, %v842_v38 }
 0x984   :  { %v844_v40 = vmul.f32 0.5, %v843_v39 }
 0x986   :  { %v845_v41 = vsub.f32 1.5, %v844_v40 }
 0x987   :  { %v990_v42 = vpop.eup %989 }
 0x988   :  { %v846_v43 = vmul.f32 %v988_v2, %v845_v41  ;;  %v852_v44 = vmul.f32 %v990_v42, %v840_v14  ;;  %vm858_vm3 = vweird.f32 %v990_v42 }
 0x989   :  { %vm859_vm5 = vmor %vm857_vm4, %vm858_vm3 }
 0x98a   :  { %v850_v21 = vsel %vm849_vm2, %v988_v2, %v846_v43  ;;  %v853_v22 = vmul.f32 %v990_v42, %v852_v44 }
 0x98b   :  { %v861_v23 = vmul.f32 %v850_v21, %v827_v10 }
 0x98c   :  { %v854_v59 = vmul.f32 0.5, %v853_v22 }
 0x98d   :  { %v864_v24 = vmul.f32 %v863_v20, %v861_v23 }
 0x98e   :  { %v855_v25 = vsub.f32 1.5, %v854_v59 }
 0x98f   :  { %v867_v26 = vadd.f32 %v866_v63, %v864_v24 }
 0x990   :  { %v856_v27 = vmul.f32 %v990_v42, %v855_v25 }
 0x991   :  { %869 = vst.msk [vmem:[#allocation7] sm:$0xff] %vm107_vm0, %v867_v26 }
 0x992   :  { %v860_v46 = vsel %vm859_vm5, %v990_v42, %v856_v27 }
 0x993   :  { %v862_v4 = vmul.f32 %v860_v46, %v828_v30 }
 0x995   :  { %v865_v47 = vmul.f32 %v863_v20, %v862_v4 }
 0x997   :  { %v868_v45 = vadd.f32 %v866_v63, %v865_v47 }
 0x999   :  { %870 = vst.msk [vmem:[#allocation7 + $0x8] sm:$0xff] %vm107_vm0, %v868_v45 }
 0x99a   :  { %883 = dma.vmem_to_hbm [thread:$0]  %s876_s11, 256, %s878_s6, [#allocation4], %s1070_s13, %s1070_s13, %s1071_s14  }
 0x99b   :  { %1067 = dma.done.wait [#allocation4], 256  }
 0x99c   :  { %1068 = vsyncadd [#allocation4], 4294967040 }
 0x99d   :  { %888 = vsyncpa [#allocation3], 1 }
 0x99e   :  { %889 = vsyncpa [#allocation6], 1 }
 0x99f   :  { %890 = vsyncpa [#allocation4], 1 }

</bundles_post_ra>
